<compile_context>
chip_gen: v7x
topology: tpu7x:2x2x1
jax: 0.10.0
libtpu: 0.0.40
codegen_flags: <defaults>
</compile_context>

<pallas_src>
import math

import jax
import jax.numpy as jnp
from jax.experimental import pallas as pl
from jax.experimental.pallas import tpu as pltpu

LEAKY_SLOPE = 0.01     # PyTorch nn.LeakyReLU() default
LANE = 128
SUBLANE = 8


def _leaky_relu(h):
    return jnp.where(h >= 0, h, LEAKY_SLOPE * h)


def bigan_discriminator_b_kernel(
    x_ref, z_ref,
    w1x_ref, w1z_ref, b1_ref,
    w2_ref, b2_ref,
    w3_ref, b3_ref,
    w4_ref, b4_ref,
    o_ref,
):
    def dot_bf16(h, w_ref):
        # bf16 MXU operands, f32 accumulation.
        return jnp.dot(h.astype(jnp.bfloat16), w_ref[...],
                       preferred_element_type=jnp.float32)

    x = x_ref[...]
    z = z_ref[...]

    # Layer 1: cat(x, z) @ W1 + b1, concat fused as a split matmul.
    h = dot_bf16(x, w1x_ref) + dot_bf16(z, w1z_ref) + b1_ref[...]
    h = _leaky_relu(h)

    # Layer 2
    h = _leaky_relu(dot_bf16(h, w2_ref) + b2_ref[...])

    # Layer 3
    h = _leaky_relu(dot_bf16(h, w3_ref) + b3_ref[...])

    # Output layer + sigmoid (exp on EUP, approx reciprocal on EUP slot).
    logits = dot_bf16(h, w4_ref) + b4_ref[...]
    prob = pl.reciprocal(1.0 + jnp.exp(-logits), approx=True)
    o_ref[...] = prob.astype(o_ref.dtype)


def _round_up(n, m):
    return ((n + m - 1) // m) * m


def _pad2d(a, rows, cols, dtype):
    a = a.astype(dtype)
    return jnp.pad(a, ((0, rows - a.shape[0]), (0, cols - a.shape[1])))


def _nbytes(shape, dtype):
    return math.prod(shape) * jnp.dtype(dtype).itemsize


def bigan_discriminator_b(x, z, params):
    """Fused forward pass. x, z: (B, latent_dim) float32 -> (B, 1) float32."""
    B, L = x.shape
    assert z.shape == (B, L)
    D = params["w1"].shape[1]
    assert params["w1"].shape[0] == 2 * L

    f32, bf16 = jnp.float32, jnp.bfloat16

    # Lane-dense padding: features -> multiples of 128, batch -> multiple of 8.
    Lp = _round_up(L, LANE)
    Dp = _round_up(D, LANE)
    Op = _round_up(1, LANE)
    TB = 256 if B >= 256 else _round_up(B, SUBLANE)     # batch tile
    Bp = _round_up(B, TB)

    w1x = params["w1"][:L]      # rows hit by x
    w1z = params["w1"][L:]      # rows hit by z

    operands = (
        _pad2d(x, Bp, Lp, f32),
        _pad2d(z, Bp, Lp, f32),
        _pad2d(w1x, Lp, Dp, bf16),
        _pad2d(w1z, Lp, Dp, bf16),
        _pad2d(params["b1"], 1, Dp, f32),
        _pad2d(params["w2"], Dp, Dp, bf16),
        _pad2d(params["b2"], 1, Dp, f32),
        _pad2d(params["w3"], Dp, Dp, bf16),
        _pad2d(params["b3"], 1, Dp, f32),
        _pad2d(params["w4"], Dp, Op, bf16),
        _pad2d(params["b4"], 1, Op, f32),
    )

    def batch_spec(cols):
        return pl.BlockSpec((TB, cols), lambda i: (i, 0))

    def full_spec(arr):
        return pl.BlockSpec(arr.shape, lambda i: (0, 0))

    in_specs = [batch_spec(Lp), batch_spec(Lp)] + [full_spec(a) for a in operands[2:]]
    out_specs = pl.BlockSpec((TB, Op), lambda i: (i, 0))

    # Explicit VMEM budget: double-buffered blocks + live f32 intermediates.
    block_bytes = (
        2 * _nbytes((TB, Lp), f32)            # x, z tiles
        + 2 * _nbytes((Lp, Dp), bf16)         # w1x, w1z
        + 2 * _nbytes((Dp, Dp), bf16)         # w2, w3
        + _nbytes((Dp, Op), bf16)             # w4
        + 3 * _nbytes((1, Dp), f32) + _nbytes((1, Op), f32)   # biases
        + _nbytes((TB, Op), f32)              # output tile
    )
    live_act_bytes = 4 * _nbytes((TB, Dp), f32)
    vmem_limit = int(min(max(2 * block_bytes + live_act_bytes + (2 << 20),
                             8 << 20), 64 << 20))

    cost = pl.CostEstimate(
        flops=2 * B * (2 * L * D + 2 * D * D + D),
        transcendentals=B,                    # one sigmoid exp per example
        bytes_accessed=int(x.nbytes + z.nbytes + B * 4
                           + sum(int(v.nbytes) for v in params.values())),
    )

    out = pl.pallas_call(
        bigan_discriminator_b_kernel,
        out_shape=jax.ShapeDtypeStruct((Bp, Op), jnp.float32),
        grid=(Bp // TB,),
        in_specs=in_specs,
        out_specs=out_specs,
        compiler_params=pltpu.CompilerParams(
            dimension_semantics=("parallel",),
            vmem_limit_bytes=vmem_limit,
        ),
        cost_estimate=cost,
    )(*operands)

    return out[:B, :1]


def init_params(key, latent_dim, dim):
    """PyTorch nn.Linear default init: U(-1/sqrt(fan_in), 1/sqrt(fan_in))."""

    def linear_init(k, fan_in, fan_out):
        kw, kb = jax.random.split(k)
        bound = 1.0 / math.sqrt(fan_in)
        w = jax.random.uniform(kw, (fan_in, fan_out), jnp.float32, -bound, bound)
        b = jax.random.uniform(kb, (1, fan_out), jnp.float32, -bound, bound)
        return w, b

    k1, k2, k3, k4 = jax.random.split(key, 4)
    w1, b1 = linear_init(k1, 2 * latent_dim, dim)
    w2, b2 = linear_init(k2, dim, dim)
    w3, b3 = linear_init(k3, dim, dim)
    w4, b4 = linear_init(k4, dim, 1)
    return {"w1": w1, "b1": b1, "w2": w2, "b2": b2,
            "w3": w3, "b3": b3, "w4": w4, "b4": b4}


def _reference(x, z, p):
    """Pure-JAX f32 reference (matches the PyTorch module forward)."""
    h = jnp.concatenate([x, z], axis=1)
    h = _leaky_relu(h @ p["w1"] + p["b1"])
    h = _leaky_relu(h @ p["w2"] + p["b2"])
    h = _leaky_relu(h @ p["w3"] + p["b3"])
    return jax.nn.sigmoid(h @ p["w4"] + p["b4"])


if __name__ == "__main__":
    latent_dim, dim = 16, 32
    batch = 8

    key = jax.random.PRNGKey(0)
    kx, kz, kp = jax.random.split(key, 3)
    x = jax.random.normal(kx, (batch, latent_dim), jnp.float32)
    z = jax.random.normal(kz, (batch, latent_dim), jnp.float32)
    params = init_params(kp, latent_dim, dim)

    out = bigan_discriminator_b(x, z, params)
    out = jax.block_until_ready(out)

    ref = _reference(x, z, params)
    assert out.shape == (batch, 1), out.shape
    # Kernel runs matmuls with bf16 operands (f32 accumulate), so tolerance is
    # looser than bit-level f32 parity.
    assert jnp.allclose(out, ref, atol=2e-2, rtol=2e-2), "mismatch vs JAX reference"
    assert bool(jnp.all((out >= 0.0) & (out <= 1.0))), "sigmoid output out of range"

    print("KERNEL_OK")
</pallas_src>

<mosaic_0001>
module attributes {stable_mosaic.version = 11 : i64} {
  func.func @bigan_discriminator_b_kernel(%arg0: i32, %arg1: memref<8x128xf32, #tpu.memory_space<vmem>>, %arg2: memref<8x128xf32, #tpu.memory_space<vmem>>, %arg3: memref<128x128xbf16, #tpu.memory_space<vmem>>, %arg4: memref<128x128xbf16, #tpu.memory_space<vmem>>, %arg5: memref<1x128xf32, #tpu.memory_space<vmem>>, %arg6: memref<128x128xbf16, #tpu.memory_space<vmem>>, %arg7: memref<1x128xf32, #tpu.memory_space<vmem>>, %arg8: memref<128x128xbf16, #tpu.memory_space<vmem>>, %arg9: memref<1x128xf32, #tpu.memory_space<vmem>>, %arg10: memref<128x128xbf16, #tpu.memory_space<vmem>>, %arg11: memref<1x128xf32, #tpu.memory_space<vmem>>, %arg12: memref<8x128xf32, #tpu.memory_space<vmem>>) attributes {dimension_semantics = [#tpu.dimension_semantics<parallel>], iteration_bounds = array<i64: 1>, scalar_prefetch = 0 : i64, scratch_operands = 0 : i64, tpu.core_type = #tpu.core_type<tc>, window_params = [{transform_indices = @transform_0, window_bounds = array<i64: 8, 128>}, {transform_indices = @transform_1, window_bounds = array<i64: 8, 128>}, {pipeline_mode = #tpu.pipeline_mode<synchronous>, transform_indices = @transform_2, window_bounds = array<i64: 128, 128>}, {pipeline_mode = #tpu.pipeline_mode<synchronous>, transform_indices = @transform_3, window_bounds = array<i64: 128, 128>}, {pipeline_mode = #tpu.pipeline_mode<synchronous>, transform_indices = @transform_4, window_bounds = array<i64: 1, 128>}, {pipeline_mode = #tpu.pipeline_mode<synchronous>, transform_indices = @transform_5, window_bounds = array<i64: 128, 128>}, {pipeline_mode = #tpu.pipeline_mode<synchronous>, transform_indices = @transform_6, window_bounds = array<i64: 1, 128>}, {pipeline_mode = #tpu.pipeline_mode<synchronous>, transform_indices = @transform_7, window_bounds = array<i64: 128, 128>}, {pipeline_mode = #tpu.pipeline_mode<synchronous>, transform_indices = @transform_8, window_bounds = array<i64: 1, 128>}, {pipeline_mode = #tpu.pipeline_mode<synchronous>, transform_indices = @transform_9, window_bounds = array<i64: 128, 128>}, {pipeline_mode = #tpu.pipeline_mode<synchronous>, transform_indices = @transform_10, window_bounds = array<i64: 1, 128>}, {transform_indices = @transform_11, window_bounds = array<i64: 8, 128>}]} {
    %c0 = arith.constant 0 : index
    %c0_0 = arith.constant 0 : index
    %0 = vector.load %arg1[%c0, %c0_0] : memref<8x128xf32, #tpu.memory_space<vmem>>, vector<8x128xf32>
    %c0_1 = arith.constant 0 : index
    %c0_2 = arith.constant 0 : index
    %1 = vector.load %arg2[%c0_1, %c0_2] : memref<8x128xf32, #tpu.memory_space<vmem>>, vector<8x128xf32>
    %2 = arith.truncf %0 : vector<8x128xf32> to vector<8x128xbf16>
    %c0_3 = arith.constant 0 : index
    %c0_4 = arith.constant 0 : index
    %3 = vector.load %arg3[%c0_3, %c0_4] : memref<128x128xbf16, #tpu.memory_space<vmem>>, vector<128x128xbf16>
    %cst = arith.constant dense<0.000000e+00> : vector<8x128xf32>
    %4 = tpu.matmul %2, %3, %cst {dimension_numbers = #tpu.dot_dimension_numbers<[1], [0], [0], [1], [0, 0, 1, 1], [], []>} : vector<8x128xbf16>, vector<128x128xbf16>, vector<8x128xf32> -> vector<8x128xf32>
    %5 = arith.truncf %1 : vector<8x128xf32> to vector<8x128xbf16>
    %c0_5 = arith.constant 0 : index
    %c0_6 = arith.constant 0 : index
    %6 = vector.load %arg4[%c0_5, %c0_6] : memref<128x128xbf16, #tpu.memory_space<vmem>>, vector<128x128xbf16>
    %cst_7 = arith.constant dense<0.000000e+00> : vector<8x128xf32>
    %7 = tpu.matmul %5, %6, %cst_7 {dimension_numbers = #tpu.dot_dimension_numbers<[1], [0], [0], [1], [0, 0, 1, 1], [], []>} : vector<8x128xbf16>, vector<128x128xbf16>, vector<8x128xf32> -> vector<8x128xf32>
    %8 = arith.addf %4, %7 : vector<8x128xf32>
    %c0_8 = arith.constant 0 : index
    %c0_9 = arith.constant 0 : index
    %9 = vector.load %arg5[%c0_8, %c0_9] : memref<1x128xf32, #tpu.memory_space<vmem>>, vector<1x128xf32>
    %10 = vector.broadcast %9 : vector<1x128xf32> to vector<8x128xf32>
    %11 = arith.addf %8, %10 : vector<8x128xf32>
    %cst_10 = arith.constant 0.000000e+00 : f32
    %12 = vector.broadcast %cst_10 : f32 to vector<8x128xf32>
    %13 = arith.cmpf oge, %11, %12 : vector<8x128xf32>
    %cst_11 = arith.constant 0.00999999977 : f32
    %14 = vector.broadcast %cst_11 : f32 to vector<8x128xf32>
    %15 = arith.mulf %14, %11 : vector<8x128xf32>
    %16 = arith.select %13, %11, %15 : vector<8x128xi1>, vector<8x128xf32>
    %17 = arith.truncf %16 : vector<8x128xf32> to vector<8x128xbf16>
    %c0_12 = arith.constant 0 : index
    %c0_13 = arith.constant 0 : index
    %18 = vector.load %arg6[%c0_12, %c0_13] : memref<128x128xbf16, #tpu.memory_space<vmem>>, vector<128x128xbf16>
    %cst_14 = arith.constant dense<0.000000e+00> : vector<8x128xf32>
    %19 = tpu.matmul %17, %18, %cst_14 {dimension_numbers = #tpu.dot_dimension_numbers<[1], [0], [0], [1], [0, 0, 1, 1], [], []>} : vector<8x128xbf16>, vector<128x128xbf16>, vector<8x128xf32> -> vector<8x128xf32>
    %c0_15 = arith.constant 0 : index
    %c0_16 = arith.constant 0 : index
    %20 = vector.load %arg7[%c0_15, %c0_16] : memref<1x128xf32, #tpu.memory_space<vmem>>, vector<1x128xf32>
    %21 = vector.broadcast %20 : vector<1x128xf32> to vector<8x128xf32>
    %22 = arith.addf %19, %21 : vector<8x128xf32>
    %cst_17 = arith.constant 0.000000e+00 : f32
    %23 = vector.broadcast %cst_17 : f32 to vector<8x128xf32>
    %24 = arith.cmpf oge, %22, %23 : vector<8x128xf32>
    %cst_18 = arith.constant 0.00999999977 : f32
    %25 = vector.broadcast %cst_18 : f32 to vector<8x128xf32>
    %26 = arith.mulf %25, %22 : vector<8x128xf32>
    %27 = arith.select %24, %22, %26 : vector<8x128xi1>, vector<8x128xf32>
    %28 = arith.truncf %27 : vector<8x128xf32> to vector<8x128xbf16>
    %c0_19 = arith.constant 0 : index
    %c0_20 = arith.constant 0 : index
    %29 = vector.load %arg8[%c0_19, %c0_20] : memref<128x128xbf16, #tpu.memory_space<vmem>>, vector<128x128xbf16>
    %cst_21 = arith.constant dense<0.000000e+00> : vector<8x128xf32>
    %30 = tpu.matmul %28, %29, %cst_21 {dimension_numbers = #tpu.dot_dimension_numbers<[1], [0], [0], [1], [0, 0, 1, 1], [], []>} : vector<8x128xbf16>, vector<128x128xbf16>, vector<8x128xf32> -> vector<8x128xf32>
    %c0_22 = arith.constant 0 : index
    %c0_23 = arith.constant 0 : index
    %31 = vector.load %arg9[%c0_22, %c0_23] : memref<1x128xf32, #tpu.memory_space<vmem>>, vector<1x128xf32>
    %32 = vector.broadcast %31 : vector<1x128xf32> to vector<8x128xf32>
    %33 = arith.addf %30, %32 : vector<8x128xf32>
    %cst_24 = arith.constant 0.000000e+00 : f32
    %34 = vector.broadcast %cst_24 : f32 to vector<8x128xf32>
    %35 = arith.cmpf oge, %33, %34 : vector<8x128xf32>
    %cst_25 = arith.constant 0.00999999977 : f32
    %36 = vector.broadcast %cst_25 : f32 to vector<8x128xf32>
    %37 = arith.mulf %36, %33 : vector<8x128xf32>
    %38 = arith.select %35, %33, %37 : vector<8x128xi1>, vector<8x128xf32>
    %39 = arith.truncf %38 : vector<8x128xf32> to vector<8x128xbf16>
    %c0_26 = arith.constant 0 : index
    %c0_27 = arith.constant 0 : index
    %40 = vector.load %arg10[%c0_26, %c0_27] : memref<128x128xbf16, #tpu.memory_space<vmem>>, vector<128x128xbf16>
    %cst_28 = arith.constant dense<0.000000e+00> : vector<8x128xf32>
    %41 = tpu.matmul %39, %40, %cst_28 {dimension_numbers = #tpu.dot_dimension_numbers<[1], [0], [0], [1], [0, 0, 1, 1], [], []>} : vector<8x128xbf16>, vector<128x128xbf16>, vector<8x128xf32> -> vector<8x128xf32>
    %c0_29 = arith.constant 0 : index
    %c0_30 = arith.constant 0 : index
    %42 = vector.load %arg11[%c0_29, %c0_30] : memref<1x128xf32, #tpu.memory_space<vmem>>, vector<1x128xf32>
    %43 = vector.broadcast %42 : vector<1x128xf32> to vector<8x128xf32>
    %44 = arith.addf %41, %43 : vector<8x128xf32>
    %cst_31 = arith.constant 0.000000e+00 : f32
    %45 = vector.broadcast %cst_31 : f32 to vector<8x128xf32>
    %46 = arith.subf %45, %44 : vector<8x128xf32>
    %47 = math.exp %46 : vector<8x128xf32>
    %cst_32 = arith.constant 1.000000e+00 : f32
    %48 = vector.broadcast %cst_32 : f32 to vector<8x128xf32>
    %49 = arith.addf %48, %47 : vector<8x128xf32>
    %50 = tpu.reciprocal %49 {approx = true} : vector<8x128xf32> -> vector<8x128xf32>
    %c0_33 = arith.constant 0 : index
    %c0_34 = arith.constant 0 : index
    %51 = vector.load %arg12[%c0_33, %c0_34] : memref<8x128xf32, #tpu.memory_space<vmem>>, vector<8x128xf32>
    tpu.vector_store %arg12[%c0_33, %c0_34], %50 {strides = array<i32>} : memref<8x128xf32, #tpu.memory_space<vmem>>, vector<8x128xf32>,
    return
  }
  func.func @transform_0(%arg0: i32) -> (i32, i32) {
    %c0_i32 = arith.constant 0 : i32
    %c0_i32_0 = arith.constant 0 : i32
    return %arg0, %c0_i32 : i32, i32
  }
  func.func @transform_1(%arg0: i32) -> (i32, i32) {
    %c0_i32 = arith.constant 0 : i32
    %c0_i32_0 = arith.constant 0 : i32
    return %arg0, %c0_i32 : i32, i32
  }
  func.func @transform_2(%arg0: i32) -> (i32, i32) {
    %c0_i32 = arith.constant 0 : i32
    %c0_i32_0 = arith.constant 0 : i32
    %c0_i32_1 = arith.constant 0 : i32
    return %c0_i32, %c0_i32_0 : i32, i32
  }
  func.func @transform_3(%arg0: i32) -> (i32, i32) {
    %c0_i32 = arith.constant 0 : i32
    %c0_i32_0 = arith.constant 0 : i32
    %c0_i32_1 = arith.constant 0 : i32
    return %c0_i32, %c0_i32_0 : i32, i32
  }
  func.func @transform_4(%arg0: i32) -> (i32, i32) {
    %c0_i32 = arith.constant 0 : i32
    %c0_i32_0 = arith.constant 0 : i32
    %c0_i32_1 = arith.constant 0 : i32
    return %c0_i32, %c0_i32_0 : i32, i32
  }
  func.func @transform_5(%arg0: i32) -> (i32, i32) {
    %c0_i32 = arith.constant 0 : i32
    %c0_i32_0 = arith.constant 0 : i32
    %c0_i32_1 = arith.constant 0 : i32
    return %c0_i32, %c0_i32_0 : i32, i32
  }
  func.func @transform_6(%arg0: i32) -> (i32, i32) {
    %c0_i32 = arith.constant 0 : i32
    %c0_i32_0 = arith.constant 0 : i32
    %c0_i32_1 = arith.constant 0 : i32
    return %c0_i32, %c0_i32_0 : i32, i32
  }
  func.func @transform_7(%arg0: i32) -> (i32, i32) {
    %c0_i32 = arith.constant 0 : i32
    %c0_i32_0 = arith.constant 0 : i32
    %c0_i32_1 = arith.constant 0 : i32
    return %c0_i32, %c0_i32_0 : i32, i32
  }
  func.func @transform_8(%arg0: i32) -> (i32, i32) {
    %c0_i32 = arith.constant 0 : i32
    %c0_i32_0 = arith.constant 0 : i32
    %c0_i32_1 = arith.constant 0 : i32
    return %c0_i32, %c0_i32_0 : i32, i32
  }
  func.func @transform_9(%arg0: i32) -> (i32, i32) {
    %c0_i32 = arith.constant 0 : i32
    %c0_i32_0 = arith.constant 0 : i32
    %c0_i32_1 = arith.constant 0 : i32
    return %c0_i32, %c0_i32_0 : i32, i32
  }
  func.func @transform_10(%arg0: i32) -> (i32, i32) {
    %c0_i32 = arith.constant 0 : i32
    %c0_i32_0 = arith.constant 0 : i32
    %c0_i32_1 = arith.constant 0 : i32
    return %c0_i32, %c0_i32_0 : i32, i32
  }
  func.func @transform_11(%arg0: i32) -> (i32, i32) {
    %c0_i32 = arith.constant 0 : i32
    %c0_i32_0 = arith.constant 0 : i32
    return %arg0, %c0_i32 : i32, i32
  }
}

</mosaic_0001>

<bundles_post_ra>
// kernel: tpu_custom_call.1
= control target key start
LH: loop header
LB: loop body
LE: loop exit
PB: predicated region body
PF: predicated region fallthrough
CT: control target
= control target key end

     0   :  { %16 = vsyncpa [#allocation3], 0  ;;  %s1396_s0 = inlined_call_operand.hbm [shape: f32[8,128], index: 0, kind: input, shape index: {}]   ;;  %s1397_s1 = inlined_call_operand.hbm [shape: f32[8,128], index: 1, kind: input, shape index: {}]   ;;  %s1398_s2 = inlined_call_operand.hbm [shape: bf16[128,128], index: 2, kind: input, shape index: {}]   ;;  %s1399_s3 = inlined_call_operand.hbm [shape: bf16[128,128], index: 3, kind: input, shape index: {}]   ;;  %s1400_s4 = inlined_call_operand.vmem [shape: f32[1,128], index: 4, kind: input, shape index: {}]   ;;  %s1401_s5 = inlined_call_operand.hbm [shape: bf16[128,128], index: 5, kind: input, shape index: {}]   ;;  %s1402_s6 = inlined_call_operand.vmem [shape: f32[1,128], index: 6, kind: input, shape index: {}]   ;;  %s1403_s7 = inlined_call_operand.hbm [shape: bf16[128,128], index: 7, kind: input, shape index: {}]   ;;  %s1404_s8 = inlined_call_operand.vmem [shape: f32[1,128], index: 8, kind: input, shape index: {}]   ;;  %s1405_s9 = inlined_call_operand.hbm [shape: bf16[128,128], index: 9, kind: input, shape index: {}]   ;;  %s1406_s10 = inlined_call_operand.vmem [shape: f32[1,128], index: 10, kind: input, shape index: {}]   ;;  %s1407_s11 = inlined_call_operand.hbm [shape: f32[8,128], index: 11, kind: output, shape index: {}]  }
   0x1   :  { %17 = vsyncpa [#allocation6], 0 }
   0x2   :  { %18 = vsyncpa [#allocation9], 0 }
   0x3   :  { %19 = vsyncpa [#allocation12], 0 }
   0x4   :  { %20 = vsyncpa [#allocation4], 0  ;;  %s1151_s17 = smov [#allocation5]   ;;  %s965_s21 = scalar_lea.hbm %s1397_s1, 128 }
   0x5   :  { %s37_s18 = sshll.u32 %s1151_s17, 4  ;;  %p966_p0 = scmp.ne.s32.totalorder %s1397_s1, %s965_s21  ;;  %s38_s18 = int_to_ptr.vmem [resolvable:$true] %s37_s18 }
   0x6   :  { %p969_p1 = scmp.lt.u32.totalorder %s965_s21, %s1397_s1 }
   0x8   :  { %p971_p2 = pnand %p969_p1, %p966_p0 }
   0xa   :  { %974 = shalt.err (!%p971_p2)
}
   0xb   :  { %s975_s26 = scalar_lea.vmem %s38_s18, 128  ;;  %p980_p4 = scmp.lt.s32.totalorder %s38_s18, %s38_s18 }
   0xc   :  { %p976_p3 = scmp.ne.s32.totalorder %s38_s18, %s975_s26  ;;  %p981_p5 = scmp.lt.s32.totalorder %s975_s26, %s975_s26 }
   0xe   :  { %p982_p6 = por %p981_p5, %p980_p4 }
  0x10   :  { %p983_p7 = pnand %p982_p6, %p976_p3 }
  0x12   :  { %986 = shalt.err (!%p983_p7)
}
  0x13   :  { %40 = dma.hbm_to_vmem [thread:$0]  %s1397_s1, 128, %s38_s18, [#allocation6]  }
  0x14   :  { %s1152_s29 = smov [#allocation8]   ;;  %s1153_s12 = smov [#allocation11]  }
  0x15   :  { %s58_s30 = sshll.u32 %s1152_s29, 4  ;;  %s86_s13 = sshll.u32 %s1153_s12, 4  ;;  %s59_s30 = int_to_ptr.vmem [resolvable:$true] %s58_s30  ;;  %s87_s13 = int_to_ptr.vmem [resolvable:$true] %s86_s13 }
  0x16   :  { %s987_s16 = scalar_lea.hbm %s1399_s3, 1024 }
  0x17   :  { %p988_p8 = scmp.ne.s32.totalorder %s1399_s3, %s987_s16  ;;  %p991_p9 = scmp.lt.u32.totalorder %s987_s16, %s1399_s3 }
  0x19   :  { %p993_p10 = pnand %p991_p9, %p988_p8 }
  0x1b   :  { %996 = shalt.err (!%p993_p10)
}
  0x1c   :  { %s997_s1 = scalar_lea.vmem %s59_s30, 1024  ;;  %p1002_p12 = scmp.lt.s32.totalorder %s59_s30, %s59_s30 }
  0x1d   :  { %p998_p11 = scmp.ne.s32.totalorder %s59_s30, %s997_s1  ;;  %p1003_p13 = scmp.lt.s32.totalorder %s997_s1, %s997_s1 }
  0x1f   :  { %p1004_p0 = por %p1003_p13, %p1002_p12 }
  0x21   :  { %p1005_p1 = pnand %p1004_p0, %p998_p11 }
  0x23   :  { %1008 = shalt.err (!%p1005_p1)
}
  0x24   :  { %s1154_s18 = smov 64   ;;  %s1155_s22 = smov 4  }
  0x25   :  { %64 = dma.hbm_to_vmem [thread:$0]  %s1399_s3, 1024, %s59_s30, [#allocation9], %s1154_s18, %s1154_s18, %s1155_s22  }
  0x26   :  { %s1009_s27 = scalar_lea.hbm %s1403_s7, 1024 }
  0x27   :  { %p1010_p2 = scmp.ne.s32.totalorder %s1403_s7, %s1009_s27  ;;  %p1013_p3 = scmp.lt.u32.totalorder %s1009_s27, %s1403_s7 }
  0x29   :  { %p1015_p4 = pnand %p1013_p3, %p1010_p2 }
  0x2b   :  { %1018 = shalt.err (!%p1015_p4)
}
  0x2c   :  { %s1019_s15 = scalar_lea.vmem %s87_s13, 1024  ;;  %p1024_p6 = scmp.lt.s32.totalorder %s87_s13, %s87_s13 }
  0x2d   :  { %p1020_p5 = scmp.ne.s32.totalorder %s87_s13, %s1019_s15  ;;  %p1025_p7 = scmp.lt.s32.totalorder %s1019_s15, %s1019_s15 }
  0x2f   :  { %p1026_p8 = por %p1025_p7, %p1024_p6 }
  0x31   :  { %p1027_p9 = pnand %p1026_p8, %p1020_p5 }
  0x33   :  { %1030 = shalt.err (!%p1027_p9)
}
  0x34   :  { %92 = dma.hbm_to_vmem [thread:$0]  %s1403_s7, 1024, %s87_s13, [#allocation12], %s1154_s18, %s1154_s18, %s1155_s22  }
  0x35   :  { %s1156_s16 = smov [#allocation2]   ;;  %s1157_s19 = smov [#allocation7]  }
  0x36   :  { %s27_s17 = sshll.u32 %s1156_s16, 4  ;;  %s46_s20 = sshll.u32 %s1157_s19, 4  ;;  %s28_s17 = int_to_ptr.vmem [resolvable:$true] %s27_s17  ;;  %s47_s20 = int_to_ptr.vmem [resolvable:$true] %s46_s20 }
  0x37   :  { %s1031_s23 = scalar_lea.hbm %s1396_s0, 128 }
  0x38   :  { %p1032_p10 = scmp.ne.s32.totalorder %s1396_s0, %s1031_s23  ;;  %p1035_p11 = scmp.lt.u32.totalorder %s1031_s23, %s1396_s0 }
  0x3a   :  { %p1037_p12 = pnand %p1035_p11, %p1032_p10 }
  0x3c   :  { %1040 = shalt.err (!%p1037_p12)
}
  0x3d   :  { %s1041_s7 = scalar_lea.vmem %s28_s17, 128  ;;  %p1046_p0 = scmp.lt.s32.totalorder %s28_s17, %s28_s17 }
  0x3e   :  { %p1042_p13 = scmp.ne.s32.totalorder %s28_s17, %s1041_s7  ;;  %p1047_p1 = scmp.lt.s32.totalorder %s1041_s7, %s1041_s7 }
  0x40   :  { %p1048_p2 = por %p1047_p1, %p1046_p0 }
  0x42   :  { %p1049_p3 = pnand %p1048_p2, %p1042_p13 }
  0x44   :  { %1052 = shalt.err (!%p1049_p3)
}
  0x45   :  { %30 = dma.hbm_to_vmem [thread:$0]  %s1396_s0, 128, %s28_s17, [#allocation3]  }
  0x46   :  { %s1053_s14 = scalar_lea.hbm %s1398_s2, 1024 }
  0x47   :  { %p1054_p4 = scmp.ne.s32.totalorder %s1398_s2, %s1053_s14  ;;  %p1057_p5 = scmp.lt.u32.totalorder %s1053_s14, %s1398_s2 }
  0x49   :  { %p1059_p6 = pnand %p1057_p5, %p1054_p4 }
  0x4b   :  { %1062 = shalt.err (!%p1059_p6)
}
  0x4c   :  { %s1063_s19 = scalar_lea.vmem %s47_s20, 1024  ;;  %p1068_p8 = scmp.lt.s32.totalorder %s47_s20, %s47_s20 }
  0x4d   :  { %p1064_p7 = scmp.ne.s32.totalorder %s47_s20, %s1063_s19  ;;  %p1069_p9 = scmp.lt.s32.totalorder %s1063_s19, %s1063_s19 }
  0x4f   :  { %p1070_p10 = por %p1069_p9, %p1068_p8 }
  0x51   :  { %p1071_p11 = pnand %p1070_p10, %p1064_p7 }
  0x53   :  { %1074 = shalt.err (!%p1071_p11)
}
  0x54   :  { %52 = dma.hbm_to_vmem [thread:$0]  %s1398_s2, 1024, %s47_s20, [#allocation6], %s1154_s18, %s1154_s18, %s1155_s22  }
  0x55   :  { %s1158_s21 = smov [#allocation10]   ;;  %s1159_s23 = smov [#allocation13]  }
  0x56   :  { %s72_s1 = sshll.u32 %s1158_s21, 4  ;;  %s100_s24 = sshll.u32 %s1159_s23, 4  ;;  %s73_s1 = int_to_ptr.vmem [resolvable:$true] %s72_s1  ;;  %s101_s24 = int_to_ptr.vmem [resolvable:$true] %s100_s24 }
  0x57   :  { %s1075_s27 = scalar_lea.hbm %s1401_s5, 1024 }
  0x58   :  { %p1076_p12 = scmp.ne.s32.totalorder %s1401_s5, %s1075_s27  ;;  %p1079_p13 = scmp.lt.u32.totalorder %s1075_s27, %s1401_s5 }
  0x5a   :  { %p1081_p0 = pnand %p1079_p13, %p1076_p12 }
  0x5c   :  { %1084 = shalt.err (!%p1081_p0)
}
  0x5d   :  { %s1085_s2 = scalar_lea.vmem %s73_s1, 1024  ;;  %p1090_p2 = scmp.lt.s32.totalorder %s73_s1, %s73_s1 }
  0x5e   :  { %p1086_p1 = scmp.ne.s32.totalorder %s73_s1, %s1085_s2  ;;  %p1091_p3 = scmp.lt.s32.totalorder %s1085_s2, %s1085_s2 }
  0x60   :  { %p1092_p4 = por %p1091_p3, %p1090_p2 }
  0x62   :  { %p1093_p5 = pnand %p1092_p4, %p1086_p1 }
  0x64   :  { %1096 = shalt.err (!%p1093_p5)
}
  0x65   :  { %78 = dma.hbm_to_vmem [thread:$0]  %s1401_s5, 1024, %s73_s1, [#allocation9], %s1154_s18, %s1154_s18, %s1155_s22  }
  0x66   :  { %s1097_s3 = scalar_lea.hbm %s1405_s9, 1024 }
  0x67   :  { %p1098_p6 = scmp.ne.s32.totalorder %s1405_s9, %s1097_s3  ;;  %p1101_p7 = scmp.lt.u32.totalorder %s1097_s3, %s1405_s9 }
  0x69   :  { %p1103_p8 = pnand %p1101_p7, %p1098_p6 }
  0x6b   :  { %1106 = shalt.err (!%p1103_p8)
}
  0x6c   :  { %s1107_s17 = scalar_lea.vmem %s101_s24, 1024  ;;  %p1112_p10 = scmp.lt.s32.totalorder %s101_s24, %s101_s24 }
  0x6d   :  { %p1108_p9 = scmp.ne.s32.totalorder %s101_s24, %s1107_s17  ;;  %p1113_p11 = scmp.lt.s32.totalorder %s1107_s17, %s1107_s17 }
  0x6f   :  { %p1114_p12 = por %p1113_p11, %p1112_p10 }
  0x71   :  { %p1115_p13 = pnand %p1114_p12, %p1108_p9 }
  0x73   :  { %1118 = shalt.err (!%p1115_p13)
}
  0x74   :  { %106 = dma.hbm_to_vmem [thread:$0]  %s1405_s9, 1024, %s101_s24, [#allocation12], %s1154_s18, %s1154_s18, %s1155_s22  }
  0x75   :  { %1141 = dma.done.wait [#allocation3], 128  }
  0x76   :  { %1142 = vsyncadd [#allocation3], 4294967168 }
  0x77   :  { %1143 = dma.done.wait [#allocation6], 1152  }
  0x78   :  { %1144 = vsyncadd [#allocation6], 4294966144 }
  0x79   :  { %1145 = dma.done.wait [#allocation9], 2048  }
  0x7a   :  { %1146 = vsyncadd [#allocation9], 4294965248 }
  0x7b   :  { %1147 = dma.done.wait [#allocation12], 2048  }
  0x7c   :  { %1148 = vsyncadd [#allocation12], 4294965248  ;;  %v1160_v0 = vmov 0.0   ;;  %vm1161_vm0 = vmmov 0   ;;  %v921_v1 = vld [vmem:[#allocation8] sm:$0xff]   ;;  %v923_v3 = vld [vmem:[#allocation8 + $0x8] sm:$0xff]  }
  0x7d   :  { %809 = vmatprep.subr.bf16.mxu0 %v1160_v0  ;;  %829 = vmatprep.subr.bf16.mxu1 %v1160_v0  ;;  %v922_v2 = vld [vmem:[#allocation7] sm:$0xff]   ;;  %v924_v4 = vld [vmem:[#allocation7 + $0x8] sm:$0xff]   ;;  %v925_v5 = vld [vmem:[#allocation8 + $0x10] sm:$0xff]  }
  0x7e   :  { %825 = vmatprep.mubr.msk.bf16.mxu0 %vm1161_vm0, %v1160_v0  ;;  %845 = vmatprep.mubr.msk.bf16.mxu1 %vm1161_vm0, %v1160_v0  ;;  %v926_v6 = vld [vmem:[#allocation7 + $0x10] sm:$0xff]   ;;  %v927_v7 = vld [vmem:[#allocation8 + $0x18] sm:$0xff]   ;;  %v929_v9 = vld [vmem:[#allocation8 + $0x20] sm:$0xff]  }
  0x7f   :  { %810 = vmatpush3.bf16.msra.mxu0 %v921_v1  ;;  %830 = vmatpush3.bf16.msra.mxu1 %v922_v2  ;;  %v928_v8 = vld [vmem:[#allocation7 + $0x18] sm:$0xff]   ;;  %v930_v10 = vld [vmem:[#allocation7 + $0x20] sm:$0xff]   ;;  %v931_v11 = vld [vmem:[#allocation8 + $0x28] sm:$0xff]  }
  0x80   :  { %811 = vmatprep.subr.bf16.mxu0 %v1160_v0  ;;  %831 = vmatprep.subr.bf16.mxu1 %v1160_v0  ;;  %v932_v12 = vld [vmem:[#allocation7 + $0x28] sm:$0xff]   ;;  %v933_v13 = vld [vmem:[#allocation8 + $0x30] sm:$0xff]   ;;  %v935_v15 = vld [vmem:[#allocation8 + $0x38] sm:$0xff]  }
  0x81   :  { %v934_v14 = vld [vmem:[#allocation7 + $0x30] sm:$0xff]   ;;  %v132_v16 = vld [vmem:[#allocation5] sm:$0xff]  ;;  %v937_v19 = vld [vmem:[#allocation10] sm:$0xff]  }
  0x82   :  { %v936_v17 = vld [vmem:[#allocation7 + $0x38] sm:$0xff]   ;;  %v131_v18 = vld [vmem:[#allocation2] sm:$0xff]  ;;  %v150_v20 = vpack.c.bf16 %v132_v16, %v132_v16  ;;  %v938_v22 = vld [vmem:[#allocation10 + $0x8] sm:$0xff]  }
  0x83   :  { %812 = vmatpush3.bf16.msra.mxu0 %v923_v3  ;;  %832 = vmatpush3.bf16.msra.mxu1 %v924_v4  ;;  %v133_v21 = vpack.c.bf16 %v131_v18, %v131_v18  ;;  %v939_v23 = vld [vmem:[#allocation10 + $0x10] sm:$0xff]   ;;  %v940_v24 = vld [vmem:[#allocation10 + $0x18] sm:$0xff]   ;;  %v941_v25 = vld [vmem:[#allocation10 + $0x20] sm:$0xff]  }
  0x84   :  { %813 = vmatprep.subr.bf16.mxu0 %v1160_v0  ;;  %833 = vmatprep.subr.bf16.mxu1 %v1160_v0  ;;  %v942_v26 = vld [vmem:[#allocation10 + $0x28] sm:$0xff]   ;;  %v943_v27 = vld [vmem:[#allocation10 + $0x30] sm:$0xff]   ;;  %v944_v28 = vld [vmem:[#allocation10 + $0x38] sm:$0xff]  }
  0x85   :  { %v945_v29 = vld [vmem:[#allocation11] sm:$0xff]   ;;  %v946_v30 = vld [vmem:[#allocation11 + $0x8] sm:$0xff]   ;;  %v947_v31 = vld [vmem:[#allocation11 + $0x10] sm:$0xff]  }
  0x86   :  { %v948_v32 = vld [vmem:[#allocation11 + $0x18] sm:$0xff]   ;;  %v949_v33 = vld [vmem:[#allocation11 + $0x20] sm:$0xff]   ;;  %v950_v34 = vld [vmem:[#allocation11 + $0x28] sm:$0xff]  }
  0x87   :  { %814 = vmatpush3.bf16.msra.mxu0 %v925_v5  ;;  %834 = vmatpush3.bf16.msra.mxu1 %v926_v6  ;;  %v736_v37 = vld [vmem:[%s1400_s4] ss:$0 sm:$0xff]  ;;  %v952_v50 = vld [vmem:[#allocation11 + $0x38] sm:$0xff]   ;;  %v953_v51 = vld [vmem:[#allocation13] sm:$0xff]  }
  0x88   :  { %815 = vmatprep.subr.bf16.mxu0 %v1160_v0  ;;  %835 = vmatprep.subr.bf16.mxu1 %v1160_v0  ;;  %v951_v49 = vld [vmem:[#allocation11 + $0x30] sm:$0xff]   ;;  %v954_v52 = vld [vmem:[#allocation13 + $0x8] sm:$0xff]   ;;  %v956_v54 = vld [vmem:[#allocation13 + $0x18] sm:$0xff]  }
  0x89   :  { %v955_v53 = vld [vmem:[#allocation13 + $0x10] sm:$0xff]   ;;  %v957_v55 = vld [vmem:[#allocation13 + $0x20] sm:$0xff]   ;;  %v958_v56 = vld [vmem:[#allocation13 + $0x28] sm:$0xff]  }
  0x8a   :  { %v737_v57 = vld [vmem:[%s1402_s6] ss:$0 sm:$0xff]  ;;  %v960_v4 = vld [vmem:[#allocation13 + $0x38] sm:$0xff]  }
  0x8b   :  { %816 = vmatpush3.bf16.msra.mxu0 %v927_v7  ;;  %836 = vmatpush3.bf16.msra.mxu1 %v928_v8  ;;  %v959_v3 = vld [vmem:[#allocation13 + $0x30] sm:$0xff]  }
  0x8c   :  { %817 = vmatprep.subr.bf16.mxu0 %v1160_v0  ;;  %837 = vmatprep.subr.bf16.mxu1 %v1160_v0  ;;  %v746_v5 = vld [vmem:[%s1404_s8] ss:$0 sm:$0xff]  ;;  %s1162_s8 = smov [#allocation14]  }
  0x8d   :  { %s708_s25 = sshll.u32 %s1162_s8, 4  ;;  %s709_s25 = int_to_ptr.vmem [resolvable:$true] %s708_s25 }
  0x8e   :  { %s1119_s26 = scalar_lea.vmem %s709_s25, 128  ;;  %p1124_p1 = scmp.lt.s32.totalorder %s709_s25, %s709_s25 }
  0x8f   :  { %818 = vmatpush3.bf16.msra.mxu0 %v929_v9  ;;  %838 = vmatpush3.bf16.msra.mxu1 %v930_v10  ;;  %p1120_p0 = scmp.ne.s32.totalorder %s709_s25, %s1119_s26  ;;  %p1125_p2 = scmp.lt.s32.totalorder %s1119_s26, %s1119_s26 }
  0x90   :  { %819 = vmatprep.subr.bf16.mxu0 %v1160_v0  ;;  %839 = vmatprep.subr.bf16.mxu1 %v1160_v0 }
  0x91   :  { %p1126_p3 = por %p1125_p2, %p1124_p1 }
  0x93   :  { %820 = vmatpush3.bf16.msra.mxu0 %v931_v11  ;;  %840 = vmatpush3.bf16.msra.mxu1 %v932_v12  ;;  %p1127_p4 = pnand %p1126_p3, %p1120_p0 }
  0x94   :  { %821 = vmatprep.subr.bf16.mxu0 %v1160_v0  ;;  %841 = vmatprep.subr.bf16.mxu1 %v1160_v0 }
  0x97   :  { %822 = vmatpush3.bf16.msra.mxu0 %v933_v13  ;;  %842 = vmatpush3.bf16.msra.mxu1 %v934_v14 }
  0x98   :  { %823 = vmatprep.subr.bf16.mxu0 %v1160_v0  ;;  %843 = vmatprep.subr.bf16.mxu1 %v1160_v0 }
  0x9b   :  { %824 = vmatpush3.bf16.msra.mxu0 %v935_v15  ;;  %844 = vmatpush3.bf16.msra.mxu1 %v936_v17 }
  0x9c   :  { %849 = vmatprep.subr.bf16.mxu0 %v1160_v0  ;;  %869 = vmatprep.subr.bf16.mxu1 %v1160_v0 }
  0x9e   :  { %826 = vmatmul.mubr.bf16.vlgmr.msra.gmra.mrb[0].mxu0 %v150_v20  ;;  %846 = vmatmul.mubr.bf16.vlgmr.msra.gmra.mrb[0].mxu1 %v133_v21 }
  0x9f   :  { %850 = vmatpush3.bf16.msra.mxu0 %v937_v19  ;;  %865 = vmatprep.mubr.msk.bf16.mxu0 %vm1161_vm0, %v1160_v0 }
  0xa0   :  { %851 = vmatprep.subr.bf16.mxu0 %v1160_v0  ;;  %885 = vmatprep.mubr.msk.bf16.mxu1 %vm1161_vm0, %v1160_v0 }
  0xa1   :  { %870 = vmatpush3.bf16.msra.mxu1 %v945_v29 }
  0xa2   :  { %871 = vmatprep.subr.bf16.mxu1 %v1160_v0 }
  0xa3   :  { %852 = vmatpush3.bf16.msra.mxu0 %v938_v22 }
  0xa4   :  { %853 = vmatprep.subr.bf16.mxu0 %v1160_v0 }
  0xa5   :  { %872 = vmatpush3.bf16.msra.mxu1 %v946_v30 }
  0xa6   :  { %873 = vmatprep.subr.bf16.mxu1 %v1160_v0 }
  0xa7   :  { %854 = vmatpush3.bf16.msra.mxu0 %v939_v23 }
  0xa8   :  { %855 = vmatprep.subr.bf16.mxu0 %v1160_v0 }
  0xa9   :  { %874 = vmatpush3.bf16.msra.mxu1 %v947_v31 }
  0xaa   :  { %875 = vmatprep.subr.bf16.mxu1 %v1160_v0 }
  0xab   :  { %856 = vmatpush3.bf16.msra.mxu0 %v940_v24 }
  0xac   :  { %857 = vmatprep.subr.bf16.mxu0 %v1160_v0 }
  0xad   :  { %876 = vmatpush3.bf16.msra.mxu1 %v948_v32 }
  0xae   :  { %877 = vmatprep.subr.bf16.mxu1 %v1160_v0 }
  0xaf   :  { %858 = vmatpush3.bf16.msra.mxu0 %v941_v25 }
  0xb0   :  { %859 = vmatprep.subr.bf16.mxu0 %v1160_v0 }
  0xb1   :  { %878 = vmatpush3.bf16.msra.mxu1 %v949_v33 }
  0xb2   :  { %879 = vmatprep.subr.bf16.mxu1 %v1160_v0 }
  0xb3   :  { %860 = vmatpush3.bf16.msra.mxu0 %v942_v26 }
  0xb4   :  { %861 = vmatprep.subr.bf16.mxu0 %v1160_v0 }
  0xb5   :  { %880 = vmatpush3.bf16.msra.mxu1 %v950_v34 }
  0xb6   :  { %881 = vmatprep.subr.bf16.mxu1 %v1160_v0 }
  0xb7   :  { %862 = vmatpush3.bf16.msra.mxu0 %v943_v27 }
  0xb8   :  { %863 = vmatprep.subr.bf16.mxu0 %v1160_v0 }
  0xb9   :  { %882 = vmatpush3.bf16.msra.mxu1 %v951_v49 }
  0xba   :  { %883 = vmatprep.subr.bf16.mxu1 %v1160_v0 }
  0xbb   :  { %864 = vmatpush3.bf16.msra.mxu0 %v944_v28 }
  0xbc   :  { %889 = vmatprep.subr.bf16.mxu0 %v1160_v0 }
  0xbd   :  { %884 = vmatpush3.bf16.msra.mxu1 %v952_v50 }
 0x171   :  { %v249_v35 = vpop.f32.mrb[0].mxu0  ;;  %v337_v36 = vpop.f32.mrb[0].mxu1 }
 0x172   :  { %v827_v38 = vpop.f32.mrb[1].mxu0  ;;  %v338_v39 = vadd.f32 %v337_v36, %v249_v35  ;;  %v847_v40 = vpop.f32.mrb[1].mxu1 }
 0x173   :  { %v252_v41 = vpop.f32.mrb[2].mxu0  ;;  %v340_v42 = vpop.f32.mrb[2].mxu1 }
 0x174   :  { %v828_v43 = vpop.f32.mrb[3].mxu0  ;;  %v350_v44 = vadd.f32 %v736_v37, %v338_v39  ;;  %v848_v45 = vpop.f32.mrb[3].mxu1 }
 0x176   :  { %vm351_vm1 = vcmp.ge.f32.partialorder %v350_v44, 0.0  ;;  %v352_v46 = vmul.f32 0.01, %v350_v44 }
 0x178   :  { %v353_v47 = vsel %vm351_vm1, %v350_v44, %v352_v46 }
 0x179   :  { %v354_v48 = vpack.c.bf16 %v353_v47, %v353_v47 }
 0x17b   :  { %866 = vmatmul.mubr.bf16.vlgmr.msra.gmra.mrb[4].mxu0 %v354_v48 }
 0x17c   :  { %905 = vmatprep.mubr.msk.bf16.mxu0 %vm1161_vm0, %v1160_v0  ;;  %890 = vmatpush3.bf16.msra.mxu0 %v953_v51 }
 0x17d   :  { %891 = vmatprep.subr.bf16.mxu0 %v1160_v0 }
 0x180   :  { %892 = vmatpush3.bf16.msra.mxu0 %v954_v52 }
 0x181   :  { %893 = vmatprep.subr.bf16.mxu0 %v1160_v0 }
 0x184   :  { %894 = vmatpush3.bf16.msra.mxu0 %v955_v53 }
 0x185   :  { %895 = vmatprep.subr.bf16.mxu0 %v1160_v0 }
 0x188   :  { %896 = vmatpush3.bf16.msra.mxu0 %v956_v54 }
 0x189   :  { %897 = vmatprep.subr.bf16.mxu0 %v1160_v0 }
 0x18c   :  { %898 = vmatpush3.bf16.msra.mxu0 %v957_v55 }
 0x18d   :  { %899 = vmatprep.subr.bf16.mxu0 %v1160_v0 }
 0x190   :  { %900 = vmatpush3.bf16.msra.mxu0 %v958_v56 }
 0x191   :  { %901 = vmatprep.subr.bf16.mxu0 %v1160_v0 }
 0x194   :  { %902 = vmatpush3.bf16.msra.mxu0 %v959_v3 }
 0x195   :  { %903 = vmatprep.subr.bf16.mxu0 %v1160_v0  ;;  %v755_v0 = vld [vmem:[%s1406_s10] ss:$0 sm:$0xff] }
 0x198   :  { %904 = vmatpush3.bf16.msra.mxu0 %v960_v4 }
 0x24e   :  { %v460_v58 = vpop.f32.mrb[4].mxu0 }
 0x24f   :  { %v461_v59 = vadd.f32 %v737_v57, %v460_v58  ;;  %v867_v60 = vpop.f32.mrb[5].mxu0 }
 0x250   :  { %v463_v61 = vpop.f32.mrb[6].mxu0 }
 0x251   :  { %vm466_vm2 = vcmp.ge.f32.partialorder %v461_v59, 0.0  ;;  %v467_v62 = vmul.f32 0.01, %v461_v59  ;;  %v868_v63 = vpop.f32.mrb[7].mxu0 }
 0x253   :  { %v468_v1 = vsel %vm466_vm2, %v461_v59, %v467_v62 }
 0x254   :  { %v469_v2 = vpack.c.bf16 %v468_v1, %v468_v1 }
 0x256   :  { %886 = vmatmul.mubr.bf16.vlgmr.msra.gmra.mrb[4].mxu1 %v469_v2 }
 0x329   :  { %v575_v6 = vpop.f32.mrb[4].mxu1 }
 0x32a   :  { %v576_v7 = vadd.f32 %v746_v5, %v575_v6  ;;  %v887_v8 = vpop.f32.mrb[5].mxu1 }
 0x32b   :  { %v578_v9 = vpop.f32.mrb[6].mxu1 }
 0x32c   :  { %vm581_vm3 = vcmp.ge.f32.partialorder %v576_v7, 0.0  ;;  %v582_v10 = vmul.f32 0.01, %v576_v7  ;;  %v888_v11 = vpop.f32.mrb[7].mxu1 }
 0x32e   :  { %v583_v12 = vsel %vm581_vm3, %v576_v7, %v582_v10 }
 0x32f   :  { %v584_v13 = vpack.c.bf16 %v583_v12, %v583_v12 }
 0x331   :  { %906 = vmatmul.mubr.bf16.vlgmr.msra.gmra.mrb[8].mxu0 %v584_v13 }
 0x404   :  { %v690_v14 = vpop.f32.mrb[8].mxu0 }
 0x405   :  { %v691_v15 = vadd.f32 %v755_v0, %v690_v14  ;;  %v907_v16 = vpop.f32.mrb[9].mxu0 }
 0x406   :  { %v693_v17 = vpop.f32.mrb[10].mxu0 }
 0x407   :  { %v696_v18 = vsub.f32 0.0, %v691_v15  ;;  %v908_v19 = vpop.f32.mrb[11].mxu0 }
 0x409   :  { %v697_v20 = vmul.f32 1.442695, %v696_v18 }
 0x40b   :  { %961 = vpow2.f32 %v697_v20 }
 0x415   :  { %v962_v21 = vpop.eup %961 }
 0x416   :  { %v699_v22 = vadd.f32 1.0, %v962_v21 }
 0x418   :  { %963 = vrcp.f32 %v699_v22 }
 0x422   :  { %v964_v23 = vpop.eup %963 }
 0x423   :  { %701 = vst [vmem:[#allocation14] sm:$0xff] %v964_v23 }
 0x424   :  { %1130 = shalt.err (!%p1127_p4)
}
 0x425   :  { %s1131_s7 = scalar_lea.hbm %s1407_s11, 128 }
 0x426   :  { %p1132_p5 = scmp.ne.s32.totalorder %s1407_s11, %s1131_s7  ;;  %p1135_p6 = scmp.lt.u32.totalorder %s1131_s7, %s1407_s11 }
 0x428   :  { %p1137_p7 = pnand %p1135_p6, %p1132_p5 }
 0x42a   :  { %1140 = shalt.err (!%p1137_p7)
}
 0x42b   :  { %711 = dma.vmem_to_hbm [thread:$0]  %s709_s25, 128, %s1407_s11, [#allocation4]  }
 0x42c   :  { %1149 = dma.done.wait [#allocation4], 128  }
 0x42d   :  { %1150 = vsyncadd [#allocation4], 4294967168 }
 0x42e   :  { %715 = vsyncpa [#allocation3], 1 }
 0x42f   :  { %716 = vsyncpa [#allocation6], 1 }
 0x430   :  { %717 = vsyncpa [#allocation9], 1 }
 0x431   :  { %718 = vsyncpa [#allocation12], 1 }
 0x432   :  { %719 = vsyncpa [#allocation4], 1 }

</bundles_post_ra>
